<compile_context>
chip_gen: v5e
topology: v5e:2x2
jax: 0.10.0
libtpu: 0.0.40
codegen_flags: <defaults>
</compile_context>

<pallas_src>
import functools
import math

import jax
import jax.numpy as jnp
from jax.experimental import pallas as pl
from jax.experimental.pallas import tpu as pltpu

PROJ_ZERO_INIT = False   # the PyTorch module does c_proj.weight.data.zero_()
_NEG_INF = -1e30         # finite "-inf": avoids inf-inf corner cases entirely


def _fit_tile(dim, cap, mult):
    """Largest tile <= cap that divides dim and is a multiple of `mult`.

    The full dim is always a legal block, so small dims pass through
    unchanged.  Falls back to the full dim if no aligned divisor exists.
    """
    if dim <= cap:
        return dim
    t = (cap // mult) * mult
    while t >= mult:
        if dim % t == 0:
            return t
        t -= mult
    # TODO(synk): huge prime-ish dims would need padding instead of full-dim.
    return dim


# ---------------------------------------------------------------------------
# Tiled linear kernel:  y = x @ W.T   (nn.Linear, bias=False, W is (out, in))
# ---------------------------------------------------------------------------
def _linear_kernel(x_ref, w_ref, o_ref, acc_ref):
    @pl.when(pl.program_id(2) == 0)
    def _init():
        acc_ref[...] = jnp.zeros(acc_ref.shape, acc_ref.dtype)

    # "NT" contraction (contract last dim of both operands) feeds the MXU
    # directly -- no in-kernel weight transpose / XLU relayout.
    acc_ref[...] += jax.lax.dot_general(
        x_ref[...], w_ref[...],
        dimension_numbers=(((1,), (1,)), ((), ())),
        preferred_element_type=jnp.float32)

    @pl.when(pl.program_id(2) == pl.num_programs(2) - 1)
    def _finalize():
        o_ref[...] = acc_ref[...].astype(o_ref.dtype)


def linear(x2d, w, *, out_dtype, tm_cap=512, tn_cap=512, tk_cap=512):
    """x2d: (M, K), w: (N, K) -> (M, N). Tiled matmul, bf16 MXU / f32 acc.

    512-tiles use ~4 MiB double-buffered: well inside the default scoped-VMEM
    limit on v5e/v6e/v7x, and 128/256-granular for all MXU generations.
    """
    M, K = x2d.shape
    N, K2 = w.shape
    assert K == K2
    tm = _fit_tile(M, tm_cap, 16)    # sublane dim of bf16 x / output
    tn = _fit_tile(N, tn_cap, 128)   # lane dim of output, sublane of w
    tk = _fit_tile(K, tk_cap, 128)   # lane dim of x and w
    grid = (M // tm, N // tn, K // tk)
    return pl.pallas_call(
        _linear_kernel,
        out_shape=jax.ShapeDtypeStruct((M, N), out_dtype),
        grid_spec=pltpu.PrefetchScalarGridSpec(
            num_scalar_prefetch=0,
            grid=grid,
            in_specs=[
                pl.BlockSpec((tm, tk), lambda i, j, k: (i, k)),
                pl.BlockSpec((tn, tk), lambda i, j, k: (j, k)),
            ],
            out_specs=pl.BlockSpec((tm, tn), lambda i, j, k: (i, j)),
            scratch_shapes=[pltpu.VMEM((tm, tn), jnp.float32)],
        ),
        compiler_params=pltpu.CompilerParams(
            dimension_semantics=("parallel", "parallel", "arbitrary")),
    )(x2d.astype(jnp.bfloat16), w.astype(jnp.bfloat16))


# ---------------------------------------------------------------------------
# QK pre-pass kernel: RMSNorm + RoPE (+ softmax scale folded into q), computed
# exactly once per element (hoisted out of the flash-attention kv loop).
# ---------------------------------------------------------------------------
def _qk_prep_kernel(q_ref, k_ref, cos_ref, sin_ref, qo_ref, ko_ref, *, scale):
    eps = jnp.float32(jnp.finfo(jnp.float32).eps)   # F.rms_norm default eps
    cos = cos_ref[...].astype(jnp.float32)          # bf16 tables, f32 math
    sin = sin_ref[...].astype(jnp.float32)
    dh = cos.shape[-1]

    def rotate_half(x):
        # [x1, x2] -> [x2, x1]
        if dh % 128 == 0:
            # lane-aligned head_dim: XLU rotate, co-issues with VPU work
            return pltpu.roll(x, dh // 2, axis=-1)
        # TODO(synk): small / unaligned head_dim falls back to slice+concat.
        return jnp.concatenate([x[:, dh // 2:], x[:, :dh // 2]], axis=-1)

    def prep(x, s):
        ms = jnp.mean(x * x, axis=-1, keepdims=True)
        xn = x * jax.lax.rsqrt(ms + eps)
        out = xn * cos + rotate_half(xn) * sin      # full-width rope tables
        if s is not None:
            out = out * jnp.float32(s)              # softmax scale, q only
        return out

    qo_ref[0] = prep(q_ref[0].astype(jnp.float32), scale).astype(qo_ref.dtype)
    ko_ref[0] = prep(k_ref[0].astype(jnp.float32), None).astype(ko_ref.dtype)


def qk_prep(q, k, cos_full, sin_signed, scale, *, tp_cap=256):
    """q,k: (B*H, T, Dh) bf16; tables: (T, Dh) bf16 -> (q', k') bf16."""
    BH, T, Dh = q.shape
    tp = _fit_tile(T, tp_cap, 16)
    grid = (BH, T // tp)
    x_spec = pl.BlockSpec((1, tp, Dh), lambda b, i: (b, i, 0))
    tab_spec = pl.BlockSpec((tp, Dh), lambda b, i: (i, 0))
    kernel = functools.partial(_qk_prep_kernel, scale=scale)
    return pl.pallas_call(
        kernel,
        out_shape=(jax.ShapeDtypeStruct((BH, T, Dh), jnp.bfloat16),
                   jax.ShapeDtypeStruct((BH, T, Dh), jnp.bfloat16)),
        grid_spec=pltpu.PrefetchScalarGridSpec(
            num_scalar_prefetch=0,
            grid=grid,
            in_specs=[x_spec, x_spec, tab_spec, tab_spec],
            out_specs=[x_spec, x_spec],
        ),
        compiler_params=pltpu.CompilerParams(
            dimension_semantics=("parallel", "parallel")),
    )(q, k, cos_full, sin_signed)


# ---------------------------------------------------------------------------
# Flash attention kernel: lower-triangular block schedule via scalar prefetch,
# online softmax in VMEM scratch, causal mask only on diagonal-straddling
# blocks.  q/k are already RMS-normed, rotated and (q) pre-scaled.
# ---------------------------------------------------------------------------
def _flash_attn_kernel(qi_ref, ki_ref, q_ref, k_ref, v_ref, o_ref,
                       m_ref, l_ref, acc_ref):
    t = pl.program_id(1)
    qi = qi_ref[t]
    ki = ki_ref[t]
    tq, dh = acc_ref.shape
    tk = k_ref.shape[1]

    @pl.when(ki == 0)   # every q-block's schedule starts at kv block 0
    def _init():
        m_ref[...] = jnp.full(m_ref.shape, _NEG_INF, m_ref.dtype)
        l_ref[...] = jnp.zeros(l_ref.shape, l_ref.dtype)
        acc_ref[...] = jnp.zeros(acc_ref.shape, acc_ref.dtype)

    def process(apply_mask):
        s = jax.lax.dot_general(                        # (tq, tk) f32 acc
            q_ref[0], k_ref[0],
            dimension_numbers=(((1,), (1,)), ((), ())),
            preferred_element_type=jnp.float32)
        if apply_mask:
            row = jax.lax.broadcasted_iota(jnp.int32, (tq, tk), 0) + qi * tq
            col = jax.lax.broadcasted_iota(jnp.int32, (tq, tk), 1) + ki * tk
            s = jnp.where(col <= row, s, jnp.float32(_NEG_INF))
        m_prev = m_ref[...]
        m_new = jnp.maximum(m_prev, jnp.max(s, axis=-1, keepdims=True))
        alpha = jnp.exp(m_prev - m_new)
        p = jnp.exp(s - m_new)
        l_ref[...] = alpha * l_ref[...] + jnp.sum(p, axis=-1, keepdims=True)
        acc_ref[...] = alpha * acc_ref[...] + jnp.dot(
            p.astype(jnp.bfloat16), v_ref[0],
            preferred_element_type=jnp.float32)
        m_ref[...] = m_new

    # Mask only needed when the kv block straddles the diagonal.
    needs_mask = (ki + 1) * tk - 1 > qi * tq

    @pl.when(needs_mask)
    def _masked():
        process(True)

    @pl.when(jnp.logical_not(needs_mask))
    def _unmasked():
        process(False)

    last_ki = ((qi + 1) * tq - 1) // tk     # last kv block for this q block
    @pl.when(ki == last_ki)
    def _finalize():
        inv_l = pl.reciprocal(l_ref[...], approx=False)  # once per q block
        o_ref[0] = (acc_ref[...] * inv_l).astype(o_ref.dtype)


def _build_tri_schedule(n_q, tq, tk):
    """Flat (qi, ki) schedule covering only causally-needed kv blocks."""
    qis, kis = [], []
    for i in range(n_q):
        last_k = ((i + 1) * tq - 1) // tk
        for j in range(last_k + 1):
            qis.append(i)
            kis.append(j)
    return (jnp.asarray(qis, dtype=jnp.int32),
            jnp.asarray(kis, dtype=jnp.int32))


def attention(q, k, v, *, tq_cap=256, tk_cap=128):
    """q,k,v: (B*H, T, Dh) bf16 (q,k already prepped) -> (B*H, T, Dh) bf16."""
    BH, T, Dh = q.shape
    tq = _fit_tile(T, tq_cap, 16)
    tk = _fit_tile(T, tk_cap, 16)
    n_q = T // tq
    qi_arr, ki_arr = _build_tri_schedule(n_q, tq, tk)
    n_steps = int(qi_arr.shape[0])

    q_spec = pl.BlockSpec((1, tq, Dh), lambda b, t, qi, ki: (b, qi[t], 0))
    kv_spec = pl.BlockSpec((1, tk, Dh), lambda b, t, qi, ki: (b, ki[t], 0))
    o_spec = pl.BlockSpec((1, tq, Dh), lambda b, t, qi, ki: (b, qi[t], 0))

    # TODO(synk): when head_dim < 128, pack heads along the lane axis so the
    # output stores are lane-dense instead of masked partial stores.
    # TODO(synk): on v5e consider pipeline_mode=pl.Buffered(3) on kv_spec.
    return pl.pallas_call(
        _flash_attn_kernel,
        out_shape=jax.ShapeDtypeStruct((BH, T, Dh), jnp.bfloat16),
        grid_spec=pltpu.PrefetchScalarGridSpec(
            num_scalar_prefetch=2,
            grid=(BH, n_steps),
            in_specs=[q_spec, kv_spec, kv_spec],
            out_specs=o_spec,
            scratch_shapes=[pltpu.VMEM((tq, 1), jnp.float32),   # running max
                            pltpu.VMEM((tq, 1), jnp.float32),   # running sum
                            pltpu.VMEM((tq, Dh), jnp.float32)], # accumulator
        ),
        compiler_params=pltpu.CompilerParams(
            dimension_semantics=("parallel", "arbitrary")),
    )(qi_arr, ki_arr, q, k, v)


# ---------------------------------------------------------------------------
# Rotary tables (hoisted out of the forward pass, bf16 like the reference)
# ---------------------------------------------------------------------------
def _half_rotary(T, head_dim, base=10000.0):
    inv_freq = 1.0 / (base ** (jnp.arange(0, head_dim, 2, dtype=jnp.float32)
                               / head_dim))
    freqs = jnp.outer(jnp.arange(T, dtype=jnp.float32), inv_freq)  # (T, Dh//2)
    # Reference caches cos/sin in bfloat16 before the (f32) rotary multiply.
    cos = jnp.cos(freqs).astype(jnp.bfloat16)
    sin = jnp.sin(freqs).astype(jnp.bfloat16)
    return cos, sin


def make_rotary_tables(T, head_dim, base=10000.0):
    """Full-width bf16 (T, Dh) tables: rope(x) = x*cos_full + rot_half(x)*sin_signed."""
    cos, sin = _half_rotary(T, head_dim, base)
    cos_full = jnp.concatenate([cos, cos], axis=-1)      # (T, Dh) bf16
    sin_signed = jnp.concatenate([sin, -sin], axis=-1)   # (T, Dh) bf16
    return cos_full, sin_signed


# ---------------------------------------------------------------------------
# Module wrapper
# ---------------------------------------------------------------------------
def causal_self_attention(x, params, n_head, rope_tables):
    """x: (B, T, C) float32 -> (B, T, C) float32."""
    B, T, C = x.shape
    Dh = C // n_head
    cos_full, sin_signed = rope_tables   # precomputed once per model (hoisted)
    scale = 1.0 / math.sqrt(Dh)

    # Fused QKV projection, bf16 output: x is DMA'd once for all three.
    x2d = x.reshape(B * T, C)
    qkv = linear(x2d, params["w_qkv"], out_dtype=jnp.bfloat16)   # (B*T, 3C)
    qkv = qkv.reshape(B, T, 3, n_head, Dh)

    # TODO(synk): head split/merge transposes are still XLA relayouts (now in
    # bf16); indexing the (B,T,3,H,Dh) layout directly from the attention
    # BlockSpecs would remove them but needs a lane-packed multi-head layout.
    def to_heads(t):   # (B, T, H, Dh) -> (B*H, T, Dh)
        return t.transpose(0, 2, 1, 3).reshape(B * n_head, T, Dh)

    qh = to_heads(qkv[:, :, 0])
    kh = to_heads(qkv[:, :, 1])
    vh = to_heads(qkv[:, :, 2])

    # RMSNorm + RoPE (+ scale folded into q) once per element, outside attention.
    qh, kh = qk_prep(qh, kh, cos_full, sin_signed, scale)

    yh = attention(qh, kh, vh)                            # (B*H, T, Dh) bf16
    y = yh.reshape(B, n_head, T, Dh).transpose(0, 2, 1, 3).reshape(B * T, C)
    y = linear(y, params["c_proj"], out_dtype=jnp.float32)
    return y.reshape(B, T, C)


# Pure-JAX (f32) reference for a sanity check of the Pallas path.
def _reference(x, params, n_head):
    B, T, C = x.shape
    Dh = C // n_head
    wq, wk, wv = jnp.split(params["w_qkv"], 3, axis=0)
    q = (x @ wq.T).reshape(B, T, n_head, Dh)
    k = (x @ wk.T).reshape(B, T, n_head, Dh)
    v = (x @ wv.T).reshape(B, T, n_head, Dh)
    eps = jnp.finfo(jnp.float32).eps
    rms = lambda t: t * jax.lax.rsqrt(jnp.mean(t * t, -1, keepdims=True) + eps)
    q, k = rms(q), rms(k)
    cos, sin = _half_rotary(T, Dh)
    cos = cos.astype(jnp.float32)[None, :, None, :]
    sin = sin.astype(jnp.float32)[None, :, None, :]

    def rope(t):
        d = Dh // 2
        x1, x2 = t[..., :d], t[..., d:]
        return jnp.concatenate([x1 * cos + x2 * sin, -x1 * sin + x2 * cos], -1)

    q, k = rope(q), rope(k)
    q, k, v = (t.transpose(0, 2, 1, 3) for t in (q, k, v))  # (B, H, T, Dh)
    s = jnp.einsum("bhqd,bhkd->bhqk", q, k) / math.sqrt(Dh)
    mask = jnp.tril(jnp.ones((T, T), bool))
    s = jnp.where(mask, s, -jnp.inf)
    p = jax.nn.softmax(s, axis=-1)
    y = jnp.einsum("bhqk,bhkd->bhqd", p, v).transpose(0, 2, 1, 3).reshape(B, T, C)
    return (y @ params["c_proj"].T).reshape(B, T, C)


if __name__ == "__main__":
    # Small config: B=2, T=8, n_embd=32, n_head=4 (head_dim=8)
    B, T, C, n_head = 2, 8, 32, 4

    key = jax.random.PRNGKey(0)
    kx, kq, kk, kv, kp = jax.random.split(key, 5)

    x = jax.random.normal(kx, (B, T, C), dtype=jnp.float32)

    scale = 1.0 / math.sqrt(C)
    wq = jax.random.normal(kq, (C, C), jnp.float32) * scale
    wk = jax.random.normal(kk, (C, C), jnp.float32) * scale
    wv = jax.random.normal(kv, (C, C), jnp.float32) * scale
    wp = (jnp.zeros((C, C), jnp.float32) if PROJ_ZERO_INIT
          else jax.random.normal(kp, (C, C), jnp.float32) * scale)
    params = {
        "w_qkv": jnp.concatenate([wq, wk, wv], axis=0),  # fused (3C, C)
        "c_proj": wp,
    }

    rope_tables = make_rotary_tables(T, C // n_head)     # hoisted, bf16

    y = causal_self_attention(x, params, n_head, rope_tables)
    y = jax.block_until_ready(y)

    y_ref = _reference(x, params, n_head)
    assert y.shape == (B, T, C)
    # bf16 intermediates (QKV, q/k/v, attention output) vs pure-f32 reference.
    assert jnp.allclose(y, y_ref, atol=1e-1, rtol=1e-1), "mismatch vs reference"

    print("KERNEL_OK")
</pallas_src>

<mosaic_0001>
module attributes {stable_mosaic.version = 11 : i64} {
  func.func @_linear_kernel(%arg0: i32, %arg1: i32, %arg2: i32, %arg3: memref<16x32xbf16, #tpu.memory_space<vmem>>, %arg4: memref<96x32xbf16, #tpu.memory_space<vmem>>, %arg5: memref<16x96xbf16, #tpu.memory_space<vmem>>, %arg6: memref<16x96xf32, #tpu.memory_space<vmem>>) attributes {dimension_semantics = [#tpu.dimension_semantics<parallel>, #tpu.dimension_semantics<parallel>, #tpu.dimension_semantics<arbitrary>], iteration_bounds = array<i64: 1, 1, 1>, scalar_prefetch = 0 : i64, scratch_operands = 1 : i64, tpu.core_type = #tpu.core_type<tc>, window_params = [{transform_indices = @transform_0, window_bounds = array<i64: 16, 32>}, {transform_indices = @transform_1, window_bounds = array<i64: 96, 32>}, {transform_indices = @transform_2, window_bounds = array<i64: 16, 96>}]} {
    %c0_i32 = arith.constant 0 : i32
    %0 = arith.cmpi eq, %arg2, %c0_i32 : i32
    %1 = arith.extui %0 : i1 to i32
    %c0_i32_0 = arith.constant 0 : i32
    %2 = arith.cmpi ne, %1, %c0_i32_0 : i32
    scf.if %2 {
      %cst_10 = arith.constant 0.000000e+00 : f32
      %12 = vector.broadcast %cst_10 : f32 to vector<16x96xf32>
      %c0_11 = arith.constant 0 : index
      %c0_12 = arith.constant 0 : index
      %13 = vector.load %arg6[%c0_11, %c0_12] : memref<16x96xf32, #tpu.memory_space<vmem>>, vector<16x96xf32>
      tpu.vector_store %arg6[%c0_11, %c0_12], %12 {strides = array<i32>} : memref<16x96xf32, #tpu.memory_space<vmem>>, vector<16x96xf32>,
    } else {
    }
    %c0 = arith.constant 0 : index
    %c0_1 = arith.constant 0 : index
    %3 = vector.load %arg6[%c0, %c0_1] : memref<16x96xf32, #tpu.memory_space<vmem>>, vector<16x96xf32>
    %c0_2 = arith.constant 0 : index
    %c0_3 = arith.constant 0 : index
    %4 = vector.load %arg3[%c0_2, %c0_3] : memref<16x32xbf16, #tpu.memory_space<vmem>>, vector<16x32xbf16>
    %c0_4 = arith.constant 0 : index
    %c0_5 = arith.constant 0 : index
    %5 = vector.load %arg4[%c0_4, %c0_5] : memref<96x32xbf16, #tpu.memory_space<vmem>>, vector<96x32xbf16>
    %cst = arith.constant dense<0.000000e+00> : vector<16x96xf32>
    %6 = tpu.matmul %4, %5, %cst {dimension_numbers = #tpu.dot_dimension_numbers<[1], [1], [0], [0], [0, 0, 1, 0], [], []>} : vector<16x32xbf16>, vector<96x32xbf16>, vector<16x96xf32> -> vector<16x96xf32>
    %7 = arith.addf %3, %6 : vector<16x96xf32>
    %c0_6 = arith.constant 0 : index
    %c0_7 = arith.constant 0 : index
    %8 = vector.load %arg6[%c0_6, %c0_7] : memref<16x96xf32, #tpu.memory_space<vmem>>, vector<16x96xf32>
    tpu.vector_store %arg6[%c0_6, %c0_7], %7 {strides = array<i32>} : memref<16x96xf32, #tpu.memory_space<vmem>>, vector<16x96xf32>,
    %c0_i32_8 = arith.constant 0 : i32
    %9 = arith.cmpi eq, %arg2, %c0_i32_8 : i32
    %10 = arith.extui %9 : i1 to i32
    %c0_i32_9 = arith.constant 0 : i32
    %11 = arith.cmpi ne, %10, %c0_i32_9 : i32
    scf.if %11 {
      %c0_10 = arith.constant 0 : index
      %c0_11 = arith.constant 0 : index
      %12 = vector.load %arg6[%c0_10, %c0_11] : memref<16x96xf32, #tpu.memory_space<vmem>>, vector<16x96xf32>
      %13 = arith.truncf %12 : vector<16x96xf32> to vector<16x96xbf16>
      %c0_12 = arith.constant 0 : index
      %c0_13 = arith.constant 0 : index
      %14 = vector.load %arg5[%c0_12, %c0_13] : memref<16x96xbf16, #tpu.memory_space<vmem>>, vector<16x96xbf16>
      tpu.vector_store %arg5[%c0_12, %c0_13], %13 {strides = array<i32>} : memref<16x96xbf16, #tpu.memory_space<vmem>>, vector<16x96xbf16>,
    } else {
    }
    return
  }
  func.func @transform_0(%arg0: i32, %arg1: i32, %arg2: i32) -> (i32, i32) {
    %c0_i32 = arith.constant 0 : i32
    return %arg0, %arg2 : i32, i32
  }
  func.func @transform_1(%arg0: i32, %arg1: i32, %arg2: i32) -> (i32, i32) {
    %c0_i32 = arith.constant 0 : i32
    return %arg1, %arg2 : i32, i32
  }
  func.func @transform_2(%arg0: i32, %arg1: i32, %arg2: i32) -> (i32, i32) {
    %c0_i32 = arith.constant 0 : i32
    return %arg0, %arg1 : i32, i32
  }
}

</mosaic_0001>

<bundles_post_ra>
// kernel: tpu_custom_call.1
= control target key start
LH: loop header
LB: loop body
LE: loop exit
PB: predicated region body
PF: predicated region fallthrough
CT: control target
= control target key end

     0   :  { %vm71_vm0 = vcmask 261120   ;;  %s260_s0 = inlined_call_operand.vmem [shape: bf16[16,32], index: 0, kind: input, shape index: {}]   ;;  %s261_s1 = inlined_call_operand.vmem [shape: bf16[96,32], index: 1, kind: input, shape index: {}]   ;;  %s262_s2 = inlined_call_operand.hbm [shape: bf16[16,96], index: 2, kind: output, shape index: {}]  }
   0x1   :  { %v175_v0 = vld [vmem:[%s261_s1 + $0x28] sm:$0xff] }
   0x2   :  { %7 = vsyncpa [#allocation4], 0  ;;  %v91_v1 = vsel %vm71_vm0, %v175_v0, 0  ;;  %v174_v2 = vld [vmem:[%s261_s1 + $0x20] sm:$0xff]  ;;  %v173_v4 = vld [vmem:[%s261_s1 + $0x18] sm:$0xff]  ;;  %vm17_vm1 = vcmask 785408  }
   0x3   :  { %95 = vmatpush.bf16.xpose.msra.mxu0 %v91_v1  ;;  %v88_v3 = vsel %vm71_vm0, %v174_v2, 0  ;;  %v85_v5 = vsel %vm71_vm0, %v173_v4, 0  ;;  %v206_v6 = vmov 0.0   ;;  %v172_v7 = vld [vmem:[%s261_s1 + $0x10] sm:$0xff]  ;;  %v171_v9 = vld [vmem:[%s261_s1 + $0x8] sm:$0xff]  ;;  %v170_v11 = vld [vmem:[%s261_s1] sm:$0xff] }
   0x4   :  { %18 = vst.msk [vmem:[#allocation2] sm:$0xff] %vm17_vm1, %v206_v6  ;;  %v82_v8 = vsel %vm71_vm0, %v172_v7, 0  ;;  %v79_v10 = vsel %vm71_vm0, %v171_v9, 0  ;;  %v76_v12 = vsel %vm71_vm0, %v170_v11, 0  ;;  %v169_v13 = vld [vmem:[%s260_s0] sm:$0xff]  ;;  %vm119_vm2 = vcmask 781312  }
   0x5   :  { %19 = vst.msk [vmem:[#allocation2 + $0x8] sm:$0xff] %vm17_vm1, %v206_v6  ;;  %s207_s1 = smov [#allocation3]   ;;  %s128_s25 = sshll.u32 %s262_s2, 4  ;;  %s129_s25 = int_to_ptr.hbm [resolvable:$true] %s128_s25 }
   0x6   :  { %s126_s23 = sshll.u32 %s207_s1, 4  ;;  %s208_s26 = smov 64   ;;  %s127_s23 = int_to_ptr.vmem [resolvable:$true] %s126_s23 }
   0x7   :  { %s209_s27 = smov 4  }
   0xb   :  { %96 = vmatpush.bf16.xpose.msra.mxu0 %v88_v3  ;;  %v20_v14 = vld [vmem:[#allocation2] sm:$0xff] }
   0xc   :  { %v21_v17 = vld [vmem:[#allocation2 + $0x8] sm:$0xff] }
  0x13   :  { %97 = vmatpush.bf16.xpose.msra.mxu0 %v85_v5 }
  0x1b   :  { %98 = vmatpush.bf16.xpose.msra.mxu0 %v82_v8 }
  0x23   :  { %99 = vmatpush.bf16.xpose.msra.mxu0 %v79_v10 }
  0x2b   :  { %100 = vmatpush.bf16.xpose.msra.mxu0 %v76_v12 }
  0x32   :  { %168 = vmatmul.msk.bf16.vlgmr.msra.gmra.mxu0 %vm71_vm0, %v169_v13 }
  0xaf   :  { %v102_v15 = vpop.f32.mrf.mxu0 }
  0xb0   :  { %v107_v16 = vadd.f32 %v102_v15, %v20_v14 }
  0xb2   :  { %110 = vst.msk [vmem:[#allocation2] sm:$0xff] %vm17_vm1, %v107_v16 }
  0xb7   :  { %v104_v18 = vpop.f32.mrf.mxu0 }
  0xb8   :  { %v108_v19 = vadd.f32 %v104_v18, %v21_v17 }
  0xb9   :  { %v115_v20 = vld [vmem:[#allocation2] sm:$0xff] }
  0xba   :  { %111 = vst.msk [vmem:[#allocation2 + $0x8] sm:$0xff] %vm17_vm1, %v108_v19  ;;  %v117_v21 = vpack.c.bf16 %v115_v20, %v115_v20 }
  0xbc   :  { %120 = vst.msk [vmem:[#allocation3] sm:$0xf] %vm119_vm2, %v117_v21 }
  0xc1   :  { %v116_v22 = vld [vmem:[#allocation2 + $0x8] sm:$0xff] }
  0xc2   :  { %v118_v23 = vpack.c.bf16 %v116_v22, %v116_v22 }
  0xc4   :  { %121 = vst.msk [vmem:[#allocation3 + $0x4] sm:$0xf] %vm119_vm2, %v118_v23 }
  0xc5   :  { %134 = dma.vmem_to_hbm [thread:$0]  %s127_s23, 128, %s129_s25, [#allocation4], %s208_s26, %s208_s26, %s209_s27  }
  0xc6   :  { %204 = dma.done.wait [#allocation4], 128  }
  0xc7   :  { %205 = vsyncadd [#allocation4], 4294967168 }
  0xc8   :  { %139 = vsyncpa [#allocation4], 1 }

</bundles_post_ra>
